<compile_context>
chip_gen: v7x
topology: tpu7x:2x2x1
jax: 0.10.0
libtpu: 0.0.40
codegen_flags: <defaults>
</compile_context>

<pallas_src>
import jax
import jax.numpy as jnp
from jax.experimental import pallas as pl
from jax.experimental.pallas import tpu as pltpu

_LANES = 128


def _gemv_packed_kernel(x_ref, w_ref, o_ref):
    # x_ref: (tile_p, 128) = r original rows of length ndim packed per VMEM row.
    # w_ref: (128, r) block-diagonal weights (column i holds w in lane-segment i).
    # o_ref: (tile_p, r); o[p, i] = y[p*r + i]. Single MXU matmul; compute and the
    # small writeback hide under the full-lane x DMA (kernel is HBM-bound).
    o_ref[...] = jnp.dot(
        x_ref[...], w_ref[...], preferred_element_type=jnp.float32
    ).astype(o_ref.dtype)


def _gemv_rowtile_kernel(x_ref, w_ref, o_ref):
    # General-ndim path: x_ref (tile_n, ndim), w_ref (1, ndim) broadcast row,
    # o_ref (tile_n, 1). VPU elementwise multiply + XLU lane reduce.
    prod = x_ref[...].astype(jnp.float32) * w_ref[...].astype(jnp.float32)
    o_ref[...] = jnp.sum(prod, axis=-1, keepdims=True).astype(o_ref.dtype)


def _round_up(n, m):
    return ((n + m - 1) // m) * m


def _tpu_vmem_capacity_bytes():
    """Physical VMEM per core (128 MiB on v5e/v6e, 64 MiB on v7x)."""
    try:
        return int(pltpu.get_tpu_info().vmem_capacity_bytes)
    except Exception:
        return 64 * 1024 * 1024  # conservative (v7x-sized) fallback


def _pick_tile_rows(total_rows, row_bytes, *, target_block_bytes, max_rows=32768):
    """Rows per block (multiple of 8): target ~target_block_bytes per buffer."""
    rows = (target_block_bytes // max(1, row_bytes)) // 8 * 8
    rows = min(rows, max_rows, _round_up(total_rows, 8))
    return max(8, rows)


def linear_forward(x, w):
    """Pallas equivalent of LinearModel.forward: x @ w.

    x: (N, ndim) float32
    w: (ndim, 1) float32
    returns: (N, 1) float32
    """
    N, ndim = x.shape
    assert w.shape == (ndim, 1)

    itemsize = jnp.dtype(x.dtype).itemsize
    vmem_cap = _tpu_vmem_capacity_bytes()
    # Explicit scoped-VMEM limit (~3/4 of physical): avoids v5e's 16 MiB default
    # and leaves headroom for w, output blocks and compiler scratch.
    vmem_limit = (vmem_cap // 4) * 3
    # ~8 MiB per pipelined x buffer (2 buffers ~16 MiB), never more than 1/8 of
    # physical VMEM per buffer.
    target_block_bytes = min(8 * 1024 * 1024, vmem_cap // 8)

    cost = pl.CostEstimate(
        flops=2 * N * ndim,
        transcendentals=0,
        bytes_accessed=itemsize * (N * ndim + ndim + N),
    )
    cparams = pltpu.CompilerParams(
        # Independent row-tiles: lets v7x shard grid steps across its 2
        # TensorCores; harmless no-op on single-TC v5e/v6e.
        dimension_semantics=("parallel",),
        vmem_limit_bytes=int(vmem_limit),
    )

    use_packed = (ndim < _LANES) and (_LANES % ndim == 0) and ((N * ndim) % _LANES == 0)

    if use_packed:
        # ---- lane-packed path (small ndim): full 128-lane rows everywhere ----
        r = _LANES // ndim                      # original rows per packed row
        P = (N * ndim) // _LANES                # packed row count
        x_packed = x.reshape(P, _LANES)         # free: row-major contiguous view
        # Block-diagonal weights (128, r): kron(I_r, w); column i holds w in
        # lane segment [i*ndim, (i+1)*ndim). (x_packed @ w_blk)[p, i] = y[p*r+i].
        w_blk = jnp.kron(jnp.eye(r, dtype=x.dtype), w.astype(x.dtype))

        tile_p = _pick_tile_rows(P, _LANES * itemsize,
                                 target_block_bytes=target_block_bytes)
        grid = (pl.cdiv(P, tile_p),)

        out = pl.pallas_call(
            _gemv_packed_kernel,
            out_shape=jax.ShapeDtypeStruct((P, r), x.dtype),
            grid_spec=pltpu.PrefetchScalarGridSpec(
                num_scalar_prefetch=0,
                grid=grid,
                in_specs=[
                    # x: full-lane (tile_p, 128) blocks, double-buffered by Pallas.
                    pl.BlockSpec((tile_p, _LANES), lambda i: (i, 0)),
                    # w_blk: tiny (128, r) constant block, resident across steps.
                    pl.BlockSpec((_LANES, r), lambda i: (0, 0)),
                ],
                out_specs=pl.BlockSpec((tile_p, r), lambda i: (i, 0)),
            ),
            compiler_params=cparams,
            cost_estimate=cost,
        )(x_packed, w_blk)
        return out.reshape(N, 1)

    # ---- general path (ndim >= 128 or not a divisor of 128) ----
    padded_row_bytes = _round_up(ndim, _LANES) * itemsize  # VMEM lane padding
    tile_n = _pick_tile_rows(N, padded_row_bytes,
                             target_block_bytes=target_block_bytes)
    w_row = w.reshape(1, ndim).astype(x.dtype)   # lane-dense resident row
    grid = (pl.cdiv(N, tile_n),)

    return pl.pallas_call(
        _gemv_rowtile_kernel,
        out_shape=jax.ShapeDtypeStruct((N, 1), x.dtype),
        grid_spec=pltpu.PrefetchScalarGridSpec(
            num_scalar_prefetch=0,
            grid=grid,
            in_specs=[
                # x: tiled over rows, full feature extent.
                pl.BlockSpec((tile_n, ndim), lambda i: (i, 0)),
                # w row: same block every step (resident).
                pl.BlockSpec((1, ndim), lambda i: (0, 0)),
            ],
            out_specs=pl.BlockSpec((tile_n, 1), lambda i: (i, 0)),
        ),
        compiler_params=cparams,
        cost_estimate=cost,
    )(x, w_row)


if __name__ == "__main__":
    key = jax.random.PRNGKey(0)
    k_x, k_w = jax.random.split(key)

    # Shapes consistent with the module's forward (x: (N, ndim), w: (ndim, 1)).
    N, ndim = 1024, 32
    x = jax.random.normal(k_x, (N, ndim), dtype=jnp.float32)
    # Mirror torch.rand(ndim, 1) * 0.2 - 0.1 (uniform in [-0.1, 0.1)).
    w = jax.random.uniform(k_w, (ndim, 1), dtype=jnp.float32) * 0.2 - 0.1

    fwd = jax.jit(linear_forward)
    out = jax.block_until_ready(fwd(x, w))

    # Correctness check against a high-precision JAX reference (tolerance is
    # generous only to be robust to MXU f32 rounding; indexing bugs would be O(0.1)).
    ref = jnp.matmul(x, w, precision=jax.lax.Precision.HIGHEST)
    assert out.shape == (N, 1)
    assert jnp.allclose(out, ref, atol=2e-3, rtol=2e-3)

    # Also exercise the general (non-packed) row-tiled path once.
    ndim2 = 48  # 128 % 48 != 0 -> general path
    x2 = jax.random.normal(k_x, (256, ndim2), dtype=jnp.float32)
    w2 = jax.random.uniform(k_w, (ndim2, 1), dtype=jnp.float32) * 0.2 - 0.1
    out2 = jax.block_until_ready(fwd(x2, w2))
    ref2 = jnp.matmul(x2, w2, precision=jax.lax.Precision.HIGHEST)
    assert jnp.allclose(out2, ref2, atol=2e-3, rtol=2e-3)

    print("KERNEL_OK")
</pallas_src>

<mosaic_0001>
module attributes {stable_mosaic.version = 11 : i64} {
  func.func @_gemv_packed_kernel(%arg0: i32, %arg1: memref<256x128xf32, #tpu.memory_space<vmem>>, %arg2: memref<128x4xf32, #tpu.memory_space<vmem>>, %arg3: memref<256x4xf32, #tpu.memory_space<vmem>>) attributes {dimension_semantics = [#tpu.dimension_semantics<parallel>], iteration_bounds = array<i64: 1>, scalar_prefetch = 0 : i64, scratch_operands = 0 : i64, tpu.core_type = #tpu.core_type<tc>, window_params = [{transform_indices = @transform_0, window_bounds = array<i64: 256, 128>}, {pipeline_mode = #tpu.pipeline_mode<synchronous>, transform_indices = @transform_1, window_bounds = array<i64: 128, 4>}, {transform_indices = @transform_2, window_bounds = array<i64: 256, 4>}]} {
    %c0 = arith.constant 0 : index
    %c0_0 = arith.constant 0 : index
    %0 = vector.load %arg1[%c0, %c0_0] : memref<256x128xf32, #tpu.memory_space<vmem>>, vector<256x128xf32>
    %c0_1 = arith.constant 0 : index
    %c0_2 = arith.constant 0 : index
    %1 = vector.load %arg2[%c0_1, %c0_2] : memref<128x4xf32, #tpu.memory_space<vmem>>, vector<128x4xf32>
    %cst = arith.constant dense<0.000000e+00> : vector<256x4xf32>
    %2 = tpu.matmul %0, %1, %cst {dimension_numbers = #tpu.dot_dimension_numbers<[1], [0], [0], [1], [0, 0, 1, 1], [], []>} : vector<256x128xf32>, vector<128x4xf32>, vector<256x4xf32> -> vector<256x4xf32>
    %c0_3 = arith.constant 0 : index
    %c0_4 = arith.constant 0 : index
    %3 = vector.load %arg3[%c0_3, %c0_4] : memref<256x4xf32, #tpu.memory_space<vmem>>, vector<256x4xf32>
    tpu.vector_store %arg3[%c0_3, %c0_4], %2 {strides = array<i32>} : memref<256x4xf32, #tpu.memory_space<vmem>>, vector<256x4xf32>,
    return
  }
  func.func @transform_0(%arg0: i32) -> (i32, i32) {
    %c0_i32 = arith.constant 0 : i32
    %c0_i32_0 = arith.constant 0 : i32
    return %arg0, %c0_i32 : i32, i32
  }
  func.func @transform_1(%arg0: i32) -> (i32, i32) {
    %c0_i32 = arith.constant 0 : i32
    %c0_i32_0 = arith.constant 0 : i32
    %c0_i32_1 = arith.constant 0 : i32
    return %c0_i32, %c0_i32_0 : i32, i32
  }
  func.func @transform_2(%arg0: i32) -> (i32, i32) {
    %c0_i32 = arith.constant 0 : i32
    %c0_i32_0 = arith.constant 0 : i32
    return %arg0, %c0_i32 : i32, i32
  }
}

</mosaic_0001>

<bundles_post_ra>
// kernel: linear_forward.1
= control target key start
LH: loop header
LB: loop body
LE: loop exit
PB: predicated region body
PF: predicated region fallthrough
CT: control target
= control target key end

     0   :  { %vm284_vm0 = vcmask 31744   ;;  %s784_s1 = inlined_call_operand.vmem [shape: f32[128,4], index: 1, kind: input, shape index: {}]   ;;  %s785_s0 = inlined_call_operand.vmem [shape: f32[256,128], index: 0, kind: input, shape index: {}]   ;;  %s786_s2 = inlined_call_operand.vmem [shape: f32[256,4], index: 2, kind: output, shape index: {}]  }
   0x1   :  { %v43_v0 = vld [vmem:[%s784_s1] sm:$0xff]  ;;  %v44_v1 = vld [vmem:[%s784_s1 + $0x8] sm:$0xff]  ;;  %v45_v2 = vld [vmem:[%s784_s1 + $0x10] sm:$0xff] }
   0x2   :  { %v449_v3 = vpack.c.bf16 %v44_v1, %v43_v0  ;;  %v46_v4 = vld [vmem:[%s784_s1 + $0x18] sm:$0xff]  ;;  %v47_v6 = vld [vmem:[%s784_s1 + $0x20] sm:$0xff]  ;;  %v48_v7 = vld [vmem:[%s784_s1 + $0x28] sm:$0xff] }
   0x3   :  { %v453_v5 = vpack.c.bf16 %v46_v4, %v45_v2  ;;  %v457_v8 = vpack.c.bf16 %v48_v7, %v47_v6  ;;  %v11_v9 = vld [vmem:[%s785_s0] sm:$0xff]  ;;  %v49_v11 = vld [vmem:[%s784_s1 + $0x30] sm:$0xff]  ;;  %v50_v12 = vld [vmem:[%s784_s1 + $0x38] sm:$0xff] }
   0x4   :  { %450 = vmatprep.subr.bf16.mxu0 %v449_v3  ;;  %481 = vmatprep.subr.bf16.mxu1 %v449_v3  ;;  %v27_v10 = vld [vmem:[%s785_s0 + $0x80] sm:$0xff]  ;;  %v461_v13 = vpack.c.bf16 %v50_v12, %v49_v11  ;;  %v52_v15 = vld [vmem:[%s784_s1 + $0x48] sm:$0xff]  ;;  %v53_v17 = vld [vmem:[%s784_s1 + $0x50] sm:$0xff] }
   0x5   :  { %452 = vmatpush3.bf16.msra.mxu0 %v449_v3  ;;  %489 = vmatpush3.bf16.msra.mxu1 %v449_v3  ;;  %v51_v14 = vld [vmem:[%s784_s1 + $0x40] sm:$0xff]  ;;  %v54_v18 = vld [vmem:[%s784_s1 + $0x58] sm:$0xff]  ;;  %v56_v21 = vld [vmem:[%s784_s1 + $0x68] sm:$0xff] }
   0x6   :  { %454 = vmatprep.subr.bf16.mxu0 %v453_v5  ;;  %482 = vmatprep.subr.bf16.mxu1 %v453_v5  ;;  %v465_v16 = vpack.c.bf16 %v52_v15, %v51_v14  ;;  %v469_v19 = vpack.c.bf16 %v54_v18, %v53_v17  ;;  %v55_v20 = vld [vmem:[%s784_s1 + $0x60] sm:$0xff]  ;;  %v57_v23 = vld [vmem:[%s784_s1 + $0x70] sm:$0xff]  ;;  %v58_v24 = vld [vmem:[%s784_s1 + $0x78] sm:$0xff] }
   0x7   :  { %401 = vmatprep.mubr.f32.mxu0 %v11_v9  ;;  %425 = vmatprep.mubr.f32.mxu1 %v27_v10  ;;  %v473_v22 = vpack.c.bf16 %v56_v21, %v55_v20  ;;  %v477_v25 = vpack.c.bf16 %v58_v24, %v57_v23  ;;  %v12_v26 = vld [vmem:[%s785_s0 + $0x8] sm:$0xff]  ;;  %v13_v28 = vld [vmem:[%s785_s0 + $0x10] sm:$0xff]  ;;  %v14_v30 = vld [vmem:[%s785_s0 + $0x18] sm:$0xff] }
   0x8   :  { %v28_v27 = vld [vmem:[%s785_s0 + $0x88] sm:$0xff]  ;;  %v29_v29 = vld [vmem:[%s785_s0 + $0x90] sm:$0xff]  ;;  %v30_v31 = vld [vmem:[%s785_s0 + $0x98] sm:$0xff] }
   0x9   :  { %456 = vmatpush3.bf16.msra.mxu0 %v453_v5  ;;  %490 = vmatpush3.bf16.msra.mxu1 %v453_v5  ;;  %v15_v32 = vld [vmem:[%s785_s0 + $0x20] sm:$0xff]  ;;  %v16_v34 = vld [vmem:[%s785_s0 + $0x28] sm:$0xff]  ;;  %v17_v36 = vld [vmem:[%s785_s0 + $0x30] sm:$0xff] }
   0xa   :  { %458 = vmatprep.subr.bf16.mxu0 %v457_v8  ;;  %483 = vmatprep.subr.bf16.mxu1 %v457_v8  ;;  %v31_v33 = vld [vmem:[%s785_s0 + $0xa0] sm:$0xff]  ;;  %v32_v35 = vld [vmem:[%s785_s0 + $0xa8] sm:$0xff]  ;;  %v33_v37 = vld [vmem:[%s785_s0 + $0xb0] sm:$0xff] }
   0xb   :  { %v18_v38 = vld [vmem:[%s785_s0 + $0x38] sm:$0xff]  ;;  %v19_v40 = vld [vmem:[%s785_s0 + $0x40] sm:$0xff]  ;;  %v20_v42 = vld [vmem:[%s785_s0 + $0x48] sm:$0xff] }
   0xc   :  { %v34_v39 = vld [vmem:[%s785_s0 + $0xb8] sm:$0xff]  ;;  %v35_v41 = vld [vmem:[%s785_s0 + $0xc0] sm:$0xff]  ;;  %v36_v43 = vld [vmem:[%s785_s0 + $0xc8] sm:$0xff] }
   0xd   :  { %460 = vmatpush3.bf16.msra.mxu0 %v457_v8  ;;  %491 = vmatpush3.bf16.msra.mxu1 %v457_v8  ;;  %v21_v44 = vld [vmem:[%s785_s0 + $0x50] sm:$0xff]  ;;  %v22_v46 = vld [vmem:[%s785_s0 + $0x58] sm:$0xff]  ;;  %v23_v48 = vld [vmem:[%s785_s0 + $0x60] sm:$0xff] }
   0xe   :  { %462 = vmatprep.subr.bf16.mxu0 %v461_v13  ;;  %484 = vmatprep.subr.bf16.mxu1 %v461_v13  ;;  %v37_v45 = vld [vmem:[%s785_s0 + $0xd0] sm:$0xff]  ;;  %v38_v47 = vld [vmem:[%s785_s0 + $0xd8] sm:$0xff]  ;;  %v39_v49 = vld [vmem:[%s785_s0 + $0xe0] sm:$0xff] }
   0xf   :  { %v24_v50 = vld [vmem:[%s785_s0 + $0x68] sm:$0xff]  ;;  %v25_v52 = vld [vmem:[%s785_s0 + $0x70] sm:$0xff]  ;;  %v26_v54 = vld [vmem:[%s785_s0 + $0x78] sm:$0xff] }
  0x10   :  { %v40_v51 = vld [vmem:[%s785_s0 + $0xe8] sm:$0xff]  ;;  %v41_v53 = vld [vmem:[%s785_s0 + $0xf0] sm:$0xff]  ;;  %v42_v55 = vld [vmem:[%s785_s0 + $0xf8] sm:$0xff] }
  0x11   :  { %464 = vmatpush3.bf16.msra.mxu0 %v461_v13  ;;  %492 = vmatpush3.bf16.msra.mxu1 %v461_v13 }
  0x12   :  { %466 = vmatprep.subr.bf16.mxu0 %v465_v16  ;;  %485 = vmatprep.subr.bf16.mxu1 %v465_v16 }
  0x15   :  { %468 = vmatpush3.bf16.msra.mxu0 %v465_v16  ;;  %493 = vmatpush3.bf16.msra.mxu1 %v465_v16 }
  0x16   :  { %470 = vmatprep.subr.bf16.mxu0 %v469_v19  ;;  %486 = vmatprep.subr.bf16.mxu1 %v469_v19 }
  0x19   :  { %472 = vmatpush3.bf16.msra.mxu0 %v469_v19  ;;  %494 = vmatpush3.bf16.msra.mxu1 %v469_v19 }
  0x1a   :  { %474 = vmatprep.subr.bf16.mxu0 %v473_v22  ;;  %487 = vmatprep.subr.bf16.mxu1 %v473_v22 }
  0x1d   :  { %476 = vmatpush3.bf16.msra.mxu0 %v473_v22  ;;  %495 = vmatpush3.bf16.msra.mxu1 %v473_v22 }
  0x1e   :  { %478 = vmatprep.subr.bf16.mxu0 %v477_v25  ;;  %488 = vmatprep.subr.bf16.mxu1 %v477_v25 }
  0x21   :  { %480 = vmatpush3.bf16.msra.mxu0 %v477_v25  ;;  %496 = vmatpush3.bf16.msra.mxu1 %v477_v25 }
  0x24   :  { %402 = vmatmul.mubr.f32.vlgmr.msra.gmra.mrb[0].mxu0 %v12_v26  ;;  %426 = vmatmul.mubr.f32.vlgmr.msra.gmra.mrb[0].mxu1 %v28_v27 }
  0x25   :  { %404 = vmatprep.mubr.f32.mxu0 %v13_v28  ;;  %428 = vmatprep.mubr.f32.mxu1 %v29_v29 }
  0x28   :  { %405 = vmatmul.mubr.f32.gmra.mrb[2].mxu0 %v14_v30  ;;  %429 = vmatmul.mubr.f32.gmra.mrb[2].mxu1 %v30_v31 }
  0x29   :  { %407 = vmatprep.mubr.f32.mxu0 %v15_v32  ;;  %431 = vmatprep.mubr.f32.mxu1 %v31_v33 }
  0x2c   :  { %408 = vmatmul.mubr.f32.gmra.mrb[4].mxu0 %v16_v34  ;;  %432 = vmatmul.mubr.f32.gmra.mrb[4].mxu1 %v32_v35 }
  0x2d   :  { %410 = vmatprep.mubr.f32.mxu0 %v17_v36  ;;  %434 = vmatprep.mubr.f32.mxu1 %v33_v37 }
  0x30   :  { %411 = vmatmul.mubr.f32.gmra.mrb[6].mxu0 %v18_v38  ;;  %435 = vmatmul.mubr.f32.gmra.mrb[6].mxu1 %v34_v39 }
  0x31   :  { %413 = vmatprep.mubr.f32.mxu0 %v19_v40  ;;  %437 = vmatprep.mubr.f32.mxu1 %v35_v41 }
  0x34   :  { %414 = vmatmul.mubr.f32.gmra.mrb[8].mxu0 %v20_v42  ;;  %438 = vmatmul.mubr.f32.gmra.mrb[8].mxu1 %v36_v43 }
  0x35   :  { %416 = vmatprep.mubr.f32.mxu0 %v21_v44  ;;  %440 = vmatprep.mubr.f32.mxu1 %v37_v45 }
  0x38   :  { %417 = vmatmul.mubr.f32.gmra.mrb[10].mxu0 %v22_v46  ;;  %441 = vmatmul.mubr.f32.gmra.mrb[10].mxu1 %v38_v47 }
  0x39   :  { %419 = vmatprep.mubr.f32.mxu0 %v23_v48  ;;  %443 = vmatprep.mubr.f32.mxu1 %v39_v49 }
  0x3c   :  { %420 = vmatmul.mubr.f32.gmra.mrb[12].mxu0 %v24_v50  ;;  %444 = vmatmul.mubr.f32.gmra.mrb[12].mxu1 %v40_v51 }
  0x3d   :  { %422 = vmatprep.mubr.f32.mxu0 %v25_v52  ;;  %446 = vmatprep.mubr.f32.mxu1 %v41_v53 }
  0x40   :  { %423 = vmatmul.mubr.f32.gmra.mrb[14].mxu0 %v26_v54  ;;  %447 = vmatmul.mubr.f32.gmra.mrb[14].mxu1 %v42_v55 }
  0xf7   :  { %v403_v56 = vpop.f32.mrb[0].mxu0  ;;  %v427_v57 = vpop.f32.mrb[0].mxu1 }
  0xf8   :  { %286 = vst.msk [vmem:[%s786_s2 + $0x8] sm:$0xff] %vm284_vm0, %v403_v56  ;;  %302 = vst.msk [vmem:[%s786_s2 + $0x88] sm:$0xff] %vm284_vm0, %v427_v57  ;;  %v125_v58 = vpop.f32.mrb[1].mxu0  ;;  %v205_v59 = vpop.f32.mrb[1].mxu1 }
  0xf9   :  { %285 = vst.msk [vmem:[%s786_s2] sm:$0xff] %vm284_vm0, %v125_v58  ;;  %301 = vst.msk [vmem:[%s786_s2 + $0x80] sm:$0xff] %vm284_vm0, %v205_v59 }
  0xfb   :  { %v406_v60 = vpop.f32.mrb[2].mxu0  ;;  %v430_v61 = vpop.f32.mrb[2].mxu1 }
  0xfc   :  { %288 = vst.msk [vmem:[%s786_s2 + $0x18] sm:$0xff] %vm284_vm0, %v406_v60  ;;  %304 = vst.msk [vmem:[%s786_s2 + $0x98] sm:$0xff] %vm284_vm0, %v430_v61  ;;  %v135_v62 = vpop.f32.mrb[3].mxu0  ;;  %v215_v63 = vpop.f32.mrb[3].mxu1 }
  0xfd   :  { %287 = vst.msk [vmem:[%s786_s2 + $0x10] sm:$0xff] %vm284_vm0, %v135_v62  ;;  %303 = vst.msk [vmem:[%s786_s2 + $0x90] sm:$0xff] %vm284_vm0, %v215_v63 }
  0xff   :  { %v409_v0 = vpop.f32.mrb[4].mxu0  ;;  %v433_v1 = vpop.f32.mrb[4].mxu1 }
 0x100   :  { %290 = vst.msk [vmem:[%s786_s2 + $0x28] sm:$0xff] %vm284_vm0, %v409_v0  ;;  %306 = vst.msk [vmem:[%s786_s2 + $0xa8] sm:$0xff] %vm284_vm0, %v433_v1  ;;  %v145_v2 = vpop.f32.mrb[5].mxu0  ;;  %v225_v3 = vpop.f32.mrb[5].mxu1 }
 0x101   :  { %289 = vst.msk [vmem:[%s786_s2 + $0x20] sm:$0xff] %vm284_vm0, %v145_v2  ;;  %305 = vst.msk [vmem:[%s786_s2 + $0xa0] sm:$0xff] %vm284_vm0, %v225_v3 }
 0x103   :  { %v412_v4 = vpop.f32.mrb[6].mxu0  ;;  %v436_v5 = vpop.f32.mrb[6].mxu1 }
 0x104   :  { %292 = vst.msk [vmem:[%s786_s2 + $0x38] sm:$0xff] %vm284_vm0, %v412_v4  ;;  %308 = vst.msk [vmem:[%s786_s2 + $0xb8] sm:$0xff] %vm284_vm0, %v436_v5  ;;  %v155_v6 = vpop.f32.mrb[7].mxu0  ;;  %v235_v7 = vpop.f32.mrb[7].mxu1 }
 0x105   :  { %291 = vst.msk [vmem:[%s786_s2 + $0x30] sm:$0xff] %vm284_vm0, %v155_v6  ;;  %307 = vst.msk [vmem:[%s786_s2 + $0xb0] sm:$0xff] %vm284_vm0, %v235_v7 }
 0x107   :  { %v415_v8 = vpop.f32.mrb[8].mxu0  ;;  %v439_v9 = vpop.f32.mrb[8].mxu1 }
 0x108   :  { %294 = vst.msk [vmem:[%s786_s2 + $0x48] sm:$0xff] %vm284_vm0, %v415_v8  ;;  %310 = vst.msk [vmem:[%s786_s2 + $0xc8] sm:$0xff] %vm284_vm0, %v439_v9  ;;  %v165_v10 = vpop.f32.mrb[9].mxu0  ;;  %v245_v11 = vpop.f32.mrb[9].mxu1 }
 0x109   :  { %293 = vst.msk [vmem:[%s786_s2 + $0x40] sm:$0xff] %vm284_vm0, %v165_v10  ;;  %309 = vst.msk [vmem:[%s786_s2 + $0xc0] sm:$0xff] %vm284_vm0, %v245_v11 }
 0x10b   :  { %v418_v12 = vpop.f32.mrb[10].mxu0  ;;  %v442_v13 = vpop.f32.mrb[10].mxu1 }
 0x10c   :  { %296 = vst.msk [vmem:[%s786_s2 + $0x58] sm:$0xff] %vm284_vm0, %v418_v12  ;;  %312 = vst.msk [vmem:[%s786_s2 + $0xd8] sm:$0xff] %vm284_vm0, %v442_v13  ;;  %v175_v14 = vpop.f32.mrb[11].mxu0  ;;  %v255_v15 = vpop.f32.mrb[11].mxu1 }
 0x10d   :  { %295 = vst.msk [vmem:[%s786_s2 + $0x50] sm:$0xff] %vm284_vm0, %v175_v14  ;;  %311 = vst.msk [vmem:[%s786_s2 + $0xd0] sm:$0xff] %vm284_vm0, %v255_v15 }
 0x10f   :  { %v421_v16 = vpop.f32.mrb[12].mxu0  ;;  %v445_v17 = vpop.f32.mrb[12].mxu1 }
 0x110   :  { %298 = vst.msk [vmem:[%s786_s2 + $0x68] sm:$0xff] %vm284_vm0, %v421_v16  ;;  %314 = vst.msk [vmem:[%s786_s2 + $0xe8] sm:$0xff] %vm284_vm0, %v445_v17  ;;  %v185_v18 = vpop.f32.mrb[13].mxu0  ;;  %v265_v19 = vpop.f32.mrb[13].mxu1 }
 0x111   :  { %297 = vst.msk [vmem:[%s786_s2 + $0x60] sm:$0xff] %vm284_vm0, %v185_v18  ;;  %313 = vst.msk [vmem:[%s786_s2 + $0xe0] sm:$0xff] %vm284_vm0, %v265_v19 }
 0x113   :  { %v424_v20 = vpop.f32.mrb[14].mxu0  ;;  %v448_v21 = vpop.f32.mrb[14].mxu1 }
 0x114   :  { %300 = vst.msk [vmem:[%s786_s2 + $0x78] sm:$0xff] %vm284_vm0, %v424_v20  ;;  %316 = vst.msk [vmem:[%s786_s2 + $0xf8] sm:$0xff] %vm284_vm0, %v448_v21  ;;  %v195_v22 = vpop.f32.mrb[15].mxu0  ;;  %v275_v23 = vpop.f32.mrb[15].mxu1 }
 0x115   :  { %299 = vst.msk [vmem:[%s786_s2 + $0x70] sm:$0xff] %vm284_vm0, %v195_v22  ;;  %315 = vst.msk [vmem:[%s786_s2 + $0xf0] sm:$0xff] %vm284_vm0, %v275_v23 }

</bundles_post_ra>
